<compile_context>
chip_gen: v6e
topology: v6e:2x2x1
jax: 0.10.0
libtpu: 0.0.40
codegen_flags: <defaults>
</compile_context>

<pallas_src>
from typing import Dict

import jax
import jax.numpy as jnp
from jax.experimental import pallas as pl
from jax.experimental.pallas import tpu as pltpu

_T = 12            # number of future timesteps in the l5kit MockModel
_SLAB_W = 2 * _T   # interleaved [x0, y0, x1, y1, ..., x11, y11]
_TB_MAX = 2048     # rows per block for large batches (multiple of 8)


def _mock_kernel(adv_ref, out_ref):
    # adv_ref: (1,) f32 in SMEM; out_ref: (tb, 24) f32 block in VMEM.
    # Single fused store: even lanes (position x) = advance_x, odd lanes
    # (position y) = 0.  No zero-prefill, no partial rewrite.
    adv = adv_ref[0]
    col = jax.lax.broadcasted_iota(jnp.int32, out_ref.shape, 1)
    out_ref[...] = jnp.where((col & 1) == 0, adv, 0.0).astype(out_ref.dtype)


def mock_model_forward(x: Dict[str, jax.Array], advance_x: float = 0.0) -> Dict[str, jax.Array]:
    centroid = x["centroid"]
    bs = centroid.shape[0]

    # advance_x as a runtime SMEM scalar -> no recompile when it changes.
    adv_arr = jnp.full((1,), advance_x, dtype=jnp.float32)

    # Small batches: single full-array block.  Large batches: tile rows so a
    # block never exceeds ~0.2 MiB (VMEM-safe on v7x) and the row axis can be
    # split across TensorCores ("parallel").
    if bs <= _TB_MAX:
        tb = bs
    else:
        tb = _TB_MAX
    grid = (pl.cdiv(bs, tb),)

    slab = pl.pallas_call(
        _mock_kernel,
        out_shape=jax.ShapeDtypeStruct((bs, _SLAB_W), jnp.float32),
        grid=grid,
        in_specs=[pl.BlockSpec(memory_space=pltpu.MemorySpace.SMEM)],
        out_specs=pl.BlockSpec((tb, _SLAB_W), lambda i: (i, 0)),
        compiler_params=pltpu.CompilerParams(
            dimension_semantics=("parallel",)),
    )(adv_arr)

    # Interleaved slab -> (bs, 12, 2) is a contiguous, zero-cost reshape.
    positions = slab.reshape(bs, _T, 2)
    # yaws is an all-zero constant; let XLA fold it instead of paying kernel
    # writeback + a strided slice for it.
    yaws = jnp.zeros((bs, _T, 1), jnp.float32)
    return {"positions": positions, "yaws": yaws}


if __name__ == "__main__":
    key = jax.random.PRNGKey(0)

    # Small, deterministic example input consistent with the module:
    # 'centroid' is (batch, 2) world-space coordinates.
    bs = 2
    centroid = jax.random.normal(key, (bs, 2), dtype=jnp.float32)
    x = {"centroid": centroid}

    advance_x = 1.5
    out = mock_model_forward(x, advance_x=advance_x)
    jax.block_until_ready(out)

    # Reference check against the PyTorch semantics.
    positions_ref = jnp.zeros((bs, 12, 2), jnp.float32).at[..., 0].set(advance_x)
    yaws_ref = jnp.zeros((bs, 12, 1), jnp.float32)

    assert out["positions"].shape == (bs, 12, 2)
    assert out["yaws"].shape == (bs, 12, 1)
    assert out["positions"].dtype == jnp.float32
    assert out["yaws"].dtype == jnp.float32
    assert jnp.allclose(out["positions"], positions_ref)
    assert jnp.allclose(out["yaws"], yaws_ref)

    print("KERNEL_OK")
</pallas_src>

<mosaic_0001>
module attributes {stable_mosaic.version = 11 : i64} {
  func.func @_mock_kernel(%arg0: i32, %arg1: memref<1xf32, #tpu.memory_space<smem>>, %arg2: memref<2x24xf32, #tpu.memory_space<vmem>>) attributes {dimension_semantics = [#tpu.dimension_semantics<parallel>], iteration_bounds = array<i64: 1>, scalar_prefetch = 0 : i64, scratch_operands = 0 : i64, tpu.core_type = #tpu.core_type<tc>, window_params = [{transform_indices = @transform_0, window_bounds = array<i64: 1>}, {transform_indices = @transform_1, window_bounds = array<i64: 2, 24>}]} {
    %c0 = arith.constant 0 : index
    %0 = memref.load %arg1[%c0] : memref<1xf32, #tpu.memory_space<smem>>
    %1 = tpu.iota {dimensions = array<i32: 1>} : vector<2x24xi32>
    %c1_i32 = arith.constant 1 : i32
    %2 = vector.broadcast %c1_i32 : i32 to vector<2x24xi32>
    %3 = arith.andi %1, %2 : vector<2x24xi32>
    %c0_i32 = arith.constant 0 : i32
    %4 = vector.broadcast %c0_i32 : i32 to vector<2x24xi32>
    %5 = arith.cmpi eq, %3, %4 : vector<2x24xi32>
    %cst = arith.constant 0.000000e+00 : f32
    %6 = vector.broadcast %0 : f32 to vector<2x24xf32>
    %7 = vector.broadcast %cst : f32 to vector<2x24xf32>
    %8 = arith.select %5, %6, %7 : vector<2x24xi1>, vector<2x24xf32>
    %c0_0 = arith.constant 0 : index
    %c0_1 = arith.constant 0 : index
    %9 = vector.load %arg2[%c0_0, %c0_1] : memref<2x24xf32, #tpu.memory_space<vmem>>, vector<2x24xf32>
    tpu.vector_store %arg2[%c0_0, %c0_1], %8 {strides = array<i32>} : memref<2x24xf32, #tpu.memory_space<vmem>>, vector<2x24xf32>,
    return
  }
  func.func @transform_0(%arg0: i32) -> i32 {
    %c0_i32 = arith.constant 0 : i32
    %c0_i32_0 = arith.constant 0 : i32
    return %c0_i32 : i32
  }
  func.func @transform_1(%arg0: i32) -> (i32, i32) {
    %c0_i32 = arith.constant 0 : i32
    %c0_i32_0 = arith.constant 0 : i32
    return %arg0, %c0_i32 : i32, i32
  }
}

</mosaic_0001>

<bundles_post_ra>
// kernel: tpu_custom_call.1
= control target key start
LH: loop header
LB: loop body
LE: loop exit
PB: predicated region body
PF: predicated region fallthrough
CT: control target
= control target key end

     0   :  { %v11_v0 = vlaneseq  ;;  %s73_s0 = inlined_call_operand.<no memory space> [shape: f32[1], index: 0, kind: input, shape index: {}]   ;;  %s74_s1 = inlined_call_operand.hbm [shape: f32[2,24], index: 1, kind: output, shape index: {}]  }
   0x1   :  { %7 = vsyncpa [#allocation4], 0  ;;  %s56_s6 = smov [#allocation3]   ;;  %v15_v3 = vstv %s73_s0  ;;  %vm17_vm0 = vcmask 189440  }
   0x2   :  { %v12_v1 = vand.u32 127, %v11_v0  ;;  %s25_s7 = sshll.u32 %s56_s6, 4  ;;  %s26_s7 = int_to_ptr.vmem [resolvable:$true] %s25_s7 }
   0x3   :  { %s34_s10 = scalar_lea.vmem %s26_s7, 32  ;;  %p39_p1 = scmp.lt.s32.totalorder %s26_s7, %s26_s7 }
   0x4   :  { %v13_v2 = vand.u32 1, %v12_v1  ;;  %p35_p0 = scmp.ne.s32.totalorder %s26_s7, %s34_s10  ;;  %p40_p2 = scmp.lt.s32.totalorder %s34_s10, %s34_s10 }
   0x6   :  { %vm14_vm1 = vcmp.eq.s32.totalorder %v13_v2, 0  ;;  %p41_p3 = por %p40_p2, %p39_p1 }
   0x7   :  { %v16_v4 = vsel %vm14_vm1, %v15_v3, 0.0 }
   0x8   :  { %18 = vst.msk [vmem:[#allocation3] sm:$0x3] %vm17_vm0, %v16_v4  ;;  %p42_p4 = pnand %p41_p3, %p35_p0 }
   0xa   :  { %45 = shalt.err (!%p42_p4)
}
   0xb   :  { %28 = dma.vmem_to_hbm [thread:$0]  %s26_s7, 32, %s74_s1, [#allocation4]  }
   0xc   :  { %54 = dma.done.wait [#allocation4], 32  }
   0xd   :  { %55 = vsyncadd [#allocation4], 4294967264 }
   0xe   :  { %32 = vsyncpa [#allocation4], 1 }

</bundles_post_ra>
